<compile_context>
chip_gen: v7x
topology: tpu7x:2x2x1
jax: 0.10.0
libtpu: 0.0.40
codegen_flags: <defaults>
</compile_context>

<pallas_src>
import math

import numpy as np
import jax
import jax.numpy as jnp
from jax.experimental import pallas as pl
from jax.experimental.pallas import tpu as pltpu

# ---- config (small, consistent with the module) ----
B = 2          # batch
T = 8          # sequence length (block_size)
C = 32         # n_embd
N_HEAD = 4     # n_head
HD = C // N_HEAD
BT = B * T
EPS = 1e-5
NEG_BIG = -1e30

# ---- packed slab layout: (64, 512) f32, every slice starts on an (8, 128)
# boundary so no lane/sublane rotates are needed to feed the MXU/VPU ----
SLAB_ROWS = 64
SLAB_LANES = 512
_R_W = 0        # rows 0:32  -> weights (wattn | wproj | wfc | wfp^T), lane blocks 0/128/256/384
_R_LN = 32      # row 32     -> ln1w | ln1b | ln2w | ln2b   at lanes 0/128/256/384
_R_BIAS = 40    # row 40     -> battn | bproj | bfc | bfp   at lanes 0/128/256/384
_R_MASK = 48    # rows 48:64 -> additive causal+same-batch mask (BT, BT) at lane 0


def _layer_norm(v, w, b):
    mu = jnp.mean(v, axis=-1, keepdims=True)
    var = jnp.mean((v - mu) ** 2, axis=-1, keepdims=True)
    return (v - mu) * jax.lax.rsqrt(var + EPS) * w + b


def _gelu_exact(x):
    # PyTorch nn.GELU() default ('none') = exact erf formulation.
    return 0.5 * x * (1.0 + jax.lax.erf(x / math.sqrt(2.0)))


def block_kernel(x_ref, slab_ref, out_ref):
    # Whole (B*T, C) problem resident in VMEM in a single grid step.
    x = x_ref[...]                                           # (BT, C)

    w = slab_ref
    # weights (all lane starts are multiples of 128)
    wattn = w[0:C, 0:3 * C]                                  # (C, 3C)
    wproj = w[0:C, 128:128 + C]                              # (C, C)
    wfc = w[0:C, 256:256 + 4 * C]                            # (C, 4C)
    wfpT = w[0:C, 384:384 + 4 * C]                           # (C, 4C) == wfp.T
    # layer-norm params / biases (sublane starts are multiples of 8)
    ln1w = w[_R_LN:_R_LN + 1, 0:C]
    ln1b = w[_R_LN:_R_LN + 1, 128:128 + C]
    ln2w = w[_R_LN:_R_LN + 1, 256:256 + C]
    ln2b = w[_R_LN:_R_LN + 1, 384:384 + C]
    battn = w[_R_BIAS:_R_BIAS + 1, 0:3 * C]
    bproj = w[_R_BIAS:_R_BIAS + 1, 128:128 + C]
    bfc = w[_R_BIAS:_R_BIAS + 1, 256:256 + 4 * C]
    bfp = w[_R_BIAS:_R_BIAS + 1, 384:384 + C]
    # precomputed additive attention mask (0 where attend, -1e30 where masked)
    attn_bias = w[_R_MASK:_R_MASK + BT, 0:BT]                # (BT, BT)

    # ---- ln_1 + causal self-attention (batch folded into matmul M) ----
    h = _layer_norm(x, ln1w, ln1b)                           # (BT, C)
    qkv = jnp.dot(h, wattn, preferred_element_type=jnp.float32) + battn   # (BT, 3C)

    scale = 1.0 / math.sqrt(HD)
    head_outs = []
    for hh in range(N_HEAD):                                 # unrolled, all 2-D ops
        q_h = qkv[:, hh * HD:(hh + 1) * HD]                  # (BT, HD)
        k_h = qkv[:, C + hh * HD:C + (hh + 1) * HD]          # (BT, HD)
        v_h = qkv[:, 2 * C + hh * HD:2 * C + (hh + 1) * HD]  # (BT, HD)
        # scores: contract HD of both operands (A @ B^T on MXU, no transpose)
        s = jax.lax.dot_general(q_h, k_h, (((1,), (1,)), ((), ())),
                                preferred_element_type=jnp.float32) * scale
        s = s + attn_bias                                    # causal & same-batch
        s = s - jnp.max(s, axis=-1, keepdims=True)
        p = jnp.exp(s)
        denom = jnp.sum(p, axis=-1, keepdims=True)
        r = pl.reciprocal(denom, approx=True)                # EUP vrcp
        r = r * (2.0 - denom * r)                            # one Newton step
        head_outs.append(jnp.dot(p * r, v_h,
                                 preferred_element_type=jnp.float32))  # (BT, HD)
    y = jnp.concatenate(head_outs, axis=1)                   # (BT, C)

    y = jnp.dot(y, wproj, preferred_element_type=jnp.float32) + bproj
    x1 = x + y                                               # first residual

    # ---- ln_2 + MLP ----
    h2 = _layer_norm(x1, ln2w, ln2b)
    f = jnp.dot(h2, wfc, preferred_element_type=jnp.float32) + bfc
    f = _gelu_exact(f)
    # wfp stored transposed -> contract last dims of both operands
    f = jax.lax.dot_general(f, wfpT, (((1,), (1,)), ((), ())),
                            preferred_element_type=jnp.float32) + bfp

    out_ref[...] = x1 + f                                    # second residual


def pack_params(params):
    """Pack all weights/biases/LN params + attention mask into one slab.

    Call ONCE at parameter-setup time (not per forward call)."""
    (ln1w, ln1b, wattn, battn, wproj, bproj,
     ln2w, ln2b, wfc, bfc, wfp, bfp) = params

    slab = jnp.zeros((SLAB_ROWS, SLAB_LANES), jnp.float32)
    # weights, rows 0:C, each block starting at a 128-lane boundary
    slab = slab.at[0:C, 0:3 * C].set(wattn)
    slab = slab.at[0:C, 128:128 + C].set(wproj)
    slab = slab.at[0:C, 256:256 + 4 * C].set(wfc)
    slab = slab.at[0:C, 384:384 + 4 * C].set(wfp.T)          # stored transposed
    # layer-norm params
    slab = slab.at[_R_LN, 0:C].set(ln1w[0])
    slab = slab.at[_R_LN, 128:128 + C].set(ln1b[0])
    slab = slab.at[_R_LN, 256:256 + C].set(ln2w[0])
    slab = slab.at[_R_LN, 384:384 + C].set(ln2b[0])
    # biases
    slab = slab.at[_R_BIAS, 0:3 * C].set(battn[0])
    slab = slab.at[_R_BIAS, 128:128 + C].set(bproj[0])
    slab = slab.at[_R_BIAS, 256:256 + 4 * C].set(bfc[0])
    slab = slab.at[_R_BIAS, 384:384 + C].set(bfp[0])
    # additive causal + same-batch mask, a compile-time constant
    rows = np.arange(BT)
    same_batch = (rows[:, None] // T) == (rows[None, :] // T)
    causal = rows[None, :] <= rows[:, None]
    bias = np.where(causal & same_batch, 0.0, NEG_BIG).astype(np.float32)
    slab = slab.at[_R_MASK:_R_MASK + BT, 0:BT].set(jnp.asarray(bias))
    return slab


def gpt_block(x, slab):
    x2d = x.reshape(BT, C)                                   # fold batch into M
    out2d = pl.pallas_call(
        block_kernel,
        out_shape=jax.ShapeDtypeStruct((BT, C), jnp.float32),
        grid_spec=pltpu.PrefetchScalarGridSpec(
            num_scalar_prefetch=0,
            grid=(1,),
            in_specs=[
                pl.BlockSpec((BT, C), lambda i: (0, 0)),                 # activations
                pl.BlockSpec((SLAB_ROWS, SLAB_LANES), lambda i: (0, 0)),  # packed slab
            ],
            out_specs=pl.BlockSpec((BT, C), lambda i: (0, 0)),
        ),
        compiler_params=pltpu.CompilerParams(
            dimension_semantics=("arbitrary",)),
    )(x2d, slab)
    return out2d.reshape(B, T, C)


def gpt_block_ref(x, params):
    """Pure-JAX reference matching the PyTorch Block forward (dropout=0)."""
    (ln1w, ln1b, wattn, battn, wproj, bproj,
     ln2w, ln2b, wfc, bfc, wfp, bfp) = params
    h = _layer_norm(x, ln1w, ln1b)
    qkv = h @ wattn + battn
    q, k, v = jnp.split(qkv, 3, axis=-1)
    q = q.reshape(B, T, N_HEAD, HD).transpose(0, 2, 1, 3)
    k = k.reshape(B, T, N_HEAD, HD).transpose(0, 2, 1, 3)
    v = v.reshape(B, T, N_HEAD, HD).transpose(0, 2, 1, 3)
    att = (q @ jnp.swapaxes(k, -1, -2)) / math.sqrt(HD)
    mask = jnp.tril(jnp.ones((T, T), bool))
    att = jnp.where(mask[None, None], att, -jnp.inf)
    att = jax.nn.softmax(att, axis=-1)
    y = (att @ v).transpose(0, 2, 1, 3).reshape(B, T, C)
    y = y @ wproj + bproj
    x1 = x + y
    h2 = _layer_norm(x1, ln2w, ln2b)
    f = _gelu_exact(h2 @ wfc + bfc)
    f = f @ wfp + bfp
    return x1 + f


def make_params(key):
    ks = jax.random.split(key, 8)
    std = 0.02
    ln1w = jnp.ones((1, C), jnp.float32)
    ln1b = jnp.zeros((1, C), jnp.float32)
    ln2w = jnp.ones((1, C), jnp.float32)
    ln2b = jnp.zeros((1, C), jnp.float32)
    # linear weights stored as (in, out)
    wattn = std * jax.random.normal(ks[0], (C, 3 * C), jnp.float32)
    battn = std * jax.random.normal(ks[1], (1, 3 * C), jnp.float32)
    wproj = std * jax.random.normal(ks[2], (C, C), jnp.float32)
    bproj = std * jax.random.normal(ks[3], (1, C), jnp.float32)
    wfc = std * jax.random.normal(ks[4], (C, 4 * C), jnp.float32)
    bfc = std * jax.random.normal(ks[5], (1, 4 * C), jnp.float32)
    wfp = std * jax.random.normal(ks[6], (4 * C, C), jnp.float32)
    bfp = std * jax.random.normal(ks[7], (1, C), jnp.float32)
    return (ln1w, ln1b, wattn, battn, wproj, bproj,
            ln2w, ln2b, wfc, bfc, wfp, bfp)


if __name__ == "__main__":
    key = jax.random.PRNGKey(0)
    kx, kp = jax.random.split(key)
    x = jax.random.normal(kx, (B, T, C), jnp.float32)
    params = make_params(kp)

    slab = jax.block_until_ready(pack_params(params))        # one-time packing

    out = gpt_block(x, slab)
    out = jax.block_until_ready(out)

    ref = gpt_block_ref(x, params)
    assert out.shape == (B, T, C)
    assert jnp.allclose(out, ref, rtol=1e-4, atol=1e-4), "mismatch vs reference"
    print("KERNEL_OK")
</pallas_src>

<mosaic_0001>
module attributes {stable_mosaic.version = 11 : i64} {
  func.func @block_kernel(%arg0: i32, %arg1: memref<16x32xf32, #tpu.memory_space<vmem>>, %arg2: memref<64x512xf32, #tpu.memory_space<vmem>>, %arg3: memref<16x32xf32, #tpu.memory_space<vmem>>) attributes {dimension_semantics = [#tpu.dimension_semantics<arbitrary>], iteration_bounds = array<i64: 1>, scalar_prefetch = 0 : i64, scratch_operands = 0 : i64, tpu.core_type = #tpu.core_type<tc>, window_params = [{pipeline_mode = #tpu.pipeline_mode<synchronous>, transform_indices = @transform_0, window_bounds = array<i64: 16, 32>}, {pipeline_mode = #tpu.pipeline_mode<synchronous>, transform_indices = @transform_1, window_bounds = array<i64: 64, 512>}, {pipeline_mode = #tpu.pipeline_mode<synchronous>, transform_indices = @transform_2, window_bounds = array<i64: 16, 32>}]} {
    %c0 = arith.constant 0 : index
    %c0_0 = arith.constant 0 : index
    %0 = vector.load %arg1[%c0, %c0_0] : memref<16x32xf32, #tpu.memory_space<vmem>>, vector<16x32xf32>
    %c0_1 = arith.constant 0 : index
    %c0_2 = arith.constant 0 : index
    %1 = vector.load %arg2[%c0_1, %c0_2] : memref<64x512xf32, #tpu.memory_space<vmem>>, vector<32x96xf32>
    %c0_3 = arith.constant 0 : index
    %c128 = arith.constant 128 : index
    %2 = vector.load %arg2[%c0_3, %c128] : memref<64x512xf32, #tpu.memory_space<vmem>>, vector<32x32xf32>
    %c0_4 = arith.constant 0 : index
    %c256 = arith.constant 256 : index
    %3 = vector.load %arg2[%c0_4, %c256] : memref<64x512xf32, #tpu.memory_space<vmem>>, vector<32x128xf32>
    %c0_5 = arith.constant 0 : index
    %c384 = arith.constant 384 : index
    %4 = vector.load %arg2[%c0_5, %c384] : memref<64x512xf32, #tpu.memory_space<vmem>>, vector<32x128xf32>
    %c32 = arith.constant 32 : index
    %c0_6 = arith.constant 0 : index
    %5 = vector.load %arg2[%c32, %c0_6] : memref<64x512xf32, #tpu.memory_space<vmem>>, vector<1x32xf32>
    %c32_7 = arith.constant 32 : index
    %c128_8 = arith.constant 128 : index
    %6 = vector.load %arg2[%c32_7, %c128_8] : memref<64x512xf32, #tpu.memory_space<vmem>>, vector<1x32xf32>
    %c32_9 = arith.constant 32 : index
    %c256_10 = arith.constant 256 : index
    %7 = vector.load %arg2[%c32_9, %c256_10] : memref<64x512xf32, #tpu.memory_space<vmem>>, vector<1x32xf32>
    %c32_11 = arith.constant 32 : index
    %c384_12 = arith.constant 384 : index
    %8 = vector.load %arg2[%c32_11, %c384_12] : memref<64x512xf32, #tpu.memory_space<vmem>>, vector<1x32xf32>
    %c40 = arith.constant 40 : index
    %c0_13 = arith.constant 0 : index
    %9 = vector.load %arg2[%c40, %c0_13] : memref<64x512xf32, #tpu.memory_space<vmem>>, vector<1x96xf32>
    %c40_14 = arith.constant 40 : index
    %c128_15 = arith.constant 128 : index
    %10 = vector.load %arg2[%c40_14, %c128_15] : memref<64x512xf32, #tpu.memory_space<vmem>>, vector<1x32xf32>
    %c40_16 = arith.constant 40 : index
    %c256_17 = arith.constant 256 : index
    %11 = vector.load %arg2[%c40_16, %c256_17] : memref<64x512xf32, #tpu.memory_space<vmem>>, vector<1x128xf32>
    %c40_18 = arith.constant 40 : index
    %c384_19 = arith.constant 384 : index
    %12 = vector.load %arg2[%c40_18, %c384_19] : memref<64x512xf32, #tpu.memory_space<vmem>>, vector<1x32xf32>
    %c48 = arith.constant 48 : index
    %c0_20 = arith.constant 0 : index
    %13 = vector.load %arg2[%c48, %c0_20] : memref<64x512xf32, #tpu.memory_space<vmem>>, vector<16x16xf32>
    %cst = arith.constant dense<0.000000e+00> : vector<16xf32>
    %14 = vector.multi_reduction <add>, %0, %cst [1] : vector<16x32xf32> to vector<16xf32>
    %15 = vector.shape_cast %14 : vector<16xf32> to vector<16x1xf32>
    %cst_21 = arith.constant 3.200000e+01 : f32
    %16 = vector.broadcast %cst_21 : f32 to vector<16x1xf32>
    %17 = arith.divf %15, %16 : vector<16x1xf32>
    %18 = vector.broadcast %17 : vector<16x1xf32> to vector<16x32xf32>
    %19 = arith.subf %0, %18 : vector<16x32xf32>
    %20 = arith.mulf %19, %19 : vector<16x32xf32>
    %cst_22 = arith.constant dense<0.000000e+00> : vector<16xf32>
    %21 = vector.multi_reduction <add>, %20, %cst_22 [1] : vector<16x32xf32> to vector<16xf32>
    %22 = vector.shape_cast %21 : vector<16xf32> to vector<16x1xf32>
    %cst_23 = arith.constant 3.200000e+01 : f32
    %23 = vector.broadcast %cst_23 : f32 to vector<16x1xf32>
    %24 = arith.divf %22, %23 : vector<16x1xf32>
    %25 = vector.broadcast %17 : vector<16x1xf32> to vector<16x32xf32>
    %26 = arith.subf %0, %25 : vector<16x32xf32>
    %cst_24 = arith.constant 9.99999974E-6 : f32
    %27 = vector.broadcast %cst_24 : f32 to vector<16x1xf32>
    %28 = arith.addf %24, %27 : vector<16x1xf32>
    %29 = math.rsqrt %28 : vector<16x1xf32>
    %30 = vector.broadcast %29 : vector<16x1xf32> to vector<16x32xf32>
    %31 = arith.mulf %26, %30 : vector<16x32xf32>
    %32 = vector.broadcast %5 : vector<1x32xf32> to vector<16x32xf32>
    %33 = arith.mulf %31, %32 : vector<16x32xf32>
    %34 = vector.broadcast %6 : vector<1x32xf32> to vector<16x32xf32>
    %35 = arith.addf %33, %34 : vector<16x32xf32>
    %cst_25 = arith.constant dense<0.000000e+00> : vector<16x96xf32>
    %36 = tpu.matmul %35, %1, %cst_25 {dimension_numbers = #tpu.dot_dimension_numbers<[1], [0], [0], [1], [0, 0, 1, 1], [], []>} : vector<16x32xf32>, vector<32x96xf32>, vector<16x96xf32> -> vector<16x96xf32>
    %37 = vector.broadcast %9 : vector<1x96xf32> to vector<16x96xf32>
    %38 = arith.addf %36, %37 : vector<16x96xf32>
    %39 = vector.extract_strided_slice %38 {offsets = [0, 0], sizes = [16, 8], strides = [1, 1]} : vector<16x96xf32> to vector<16x8xf32>
    %40 = vector.extract_strided_slice %38 {offsets = [0, 32], sizes = [16, 8], strides = [1, 1]} : vector<16x96xf32> to vector<16x8xf32>
    %41 = vector.extract_strided_slice %38 {offsets = [0, 64], sizes = [16, 8], strides = [1, 1]} : vector<16x96xf32> to vector<16x8xf32>
    %cst_26 = arith.constant dense<0.000000e+00> : vector<16x16xf32>
    %42 = tpu.matmul %39, %40, %cst_26 {dimension_numbers = #tpu.dot_dimension_numbers<[1], [1], [0], [0], [0, 0, 1, 0], [], []>} : vector<16x8xf32>, vector<16x8xf32>, vector<16x16xf32> -> vector<16x16xf32>
    %cst_27 = arith.constant 0.353553385 : f32
    %43 = vector.broadcast %cst_27 : f32 to vector<16x16xf32>
    %44 = arith.mulf %42, %43 : vector<16x16xf32>
    %45 = arith.addf %44, %13 : vector<16x16xf32>
    %cst_28 = arith.constant dense<0xFF800000> : vector<16xf32>
    %46 = vector.multi_reduction <maximumf>, %45, %cst_28 [1] : vector<16x16xf32> to vector<16xf32>
    %47 = vector.shape_cast %46 : vector<16xf32> to vector<16x1xf32>
    %48 = vector.broadcast %47 : vector<16x1xf32> to vector<16x16xf32>
    %49 = arith.subf %45, %48 : vector<16x16xf32>
    %50 = math.exp %49 : vector<16x16xf32>
    %cst_29 = arith.constant dense<0.000000e+00> : vector<16xf32>
    %51 = vector.multi_reduction <add>, %50, %cst_29 [1] : vector<16x16xf32> to vector<16xf32>
    %52 = vector.shape_cast %51 : vector<16xf32> to vector<16x1xf32>
    %53 = tpu.reciprocal %52 {approx = true} : vector<16x1xf32> -> vector<16x1xf32>
    %54 = arith.mulf %52, %53 : vector<16x1xf32>
    %cst_30 = arith.constant 2.000000e+00 : f32
    %55 = vector.broadcast %cst_30 : f32 to vector<16x1xf32>
    %56 = arith.subf %55, %54 : vector<16x1xf32>
    %57 = arith.mulf %53, %56 : vector<16x1xf32>
    %58 = vector.broadcast %57 : vector<16x1xf32> to vector<16x16xf32>
    %59 = arith.mulf %50, %58 : vector<16x16xf32>
    %cst_31 = arith.constant dense<0.000000e+00> : vector<16x8xf32>
    %60 = tpu.matmul %59, %41, %cst_31 {dimension_numbers = #tpu.dot_dimension_numbers<[1], [0], [0], [1], [0, 0, 1, 1], [], []>} : vector<16x16xf32>, vector<16x8xf32>, vector<16x8xf32> -> vector<16x8xf32>
    %61 = vector.extract_strided_slice %38 {offsets = [0, 8], sizes = [16, 8], strides = [1, 1]} : vector<16x96xf32> to vector<16x8xf32>
    %62 = vector.extract_strided_slice %38 {offsets = [0, 40], sizes = [16, 8], strides = [1, 1]} : vector<16x96xf32> to vector<16x8xf32>
    %63 = vector.extract_strided_slice %38 {offsets = [0, 72], sizes = [16, 8], strides = [1, 1]} : vector<16x96xf32> to vector<16x8xf32>
    %cst_32 = arith.constant dense<0.000000e+00> : vector<16x16xf32>
    %64 = tpu.matmul %61, %62, %cst_32 {dimension_numbers = #tpu.dot_dimension_numbers<[1], [1], [0], [0], [0, 0, 1, 0], [], []>} : vector<16x8xf32>, vector<16x8xf32>, vector<16x16xf32> -> vector<16x16xf32>
    %cst_33 = arith.constant 0.353553385 : f32
    %65 = vector.broadcast %cst_33 : f32 to vector<16x16xf32>
    %66 = arith.mulf %64, %65 : vector<16x16xf32>
    %67 = arith.addf %66, %13 : vector<16x16xf32>
    %cst_34 = arith.constant dense<0xFF800000> : vector<16xf32>
    %68 = vector.multi_reduction <maximumf>, %67, %cst_34 [1] : vector<16x16xf32> to vector<16xf32>
    %69 = vector.shape_cast %68 : vector<16xf32> to vector<16x1xf32>
    %70 = vector.broadcast %69 : vector<16x1xf32> to vector<16x16xf32>
    %71 = arith.subf %67, %70 : vector<16x16xf32>
    %72 = math.exp %71 : vector<16x16xf32>
    %cst_35 = arith.constant dense<0.000000e+00> : vector<16xf32>
    %73 = vector.multi_reduction <add>, %72, %cst_35 [1] : vector<16x16xf32> to vector<16xf32>
    %74 = vector.shape_cast %73 : vector<16xf32> to vector<16x1xf32>
    %75 = tpu.reciprocal %74 {approx = true} : vector<16x1xf32> -> vector<16x1xf32>
    %76 = arith.mulf %74, %75 : vector<16x1xf32>
    %cst_36 = arith.constant 2.000000e+00 : f32
    %77 = vector.broadcast %cst_36 : f32 to vector<16x1xf32>
    %78 = arith.subf %77, %76 : vector<16x1xf32>
    %79 = arith.mulf %75, %78 : vector<16x1xf32>
    %80 = vector.broadcast %79 : vector<16x1xf32> to vector<16x16xf32>
    %81 = arith.mulf %72, %80 : vector<16x16xf32>
    %cst_37 = arith.constant dense<0.000000e+00> : vector<16x8xf32>
    %82 = tpu.matmul %81, %63, %cst_37 {dimension_numbers = #tpu.dot_dimension_numbers<[1], [0], [0], [1], [0, 0, 1, 1], [], []>} : vector<16x16xf32>, vector<16x8xf32>, vector<16x8xf32> -> vector<16x8xf32>
    %83 = vector.extract_strided_slice %38 {offsets = [0, 16], sizes = [16, 8], strides = [1, 1]} : vector<16x96xf32> to vector<16x8xf32>
    %84 = vector.extract_strided_slice %38 {offsets = [0, 48], sizes = [16, 8], strides = [1, 1]} : vector<16x96xf32> to vector<16x8xf32>
    %85 = vector.extract_strided_slice %38 {offsets = [0, 80], sizes = [16, 8], strides = [1, 1]} : vector<16x96xf32> to vector<16x8xf32>
    %cst_38 = arith.constant dense<0.000000e+00> : vector<16x16xf32>
    %86 = tpu.matmul %83, %84, %cst_38 {dimension_numbers = #tpu.dot_dimension_numbers<[1], [1], [0], [0], [0, 0, 1, 0], [], []>} : vector<16x8xf32>, vector<16x8xf32>, vector<16x16xf32> -> vector<16x16xf32>
    %cst_39 = arith.constant 0.353553385 : f32
    %87 = vector.broadcast %cst_39 : f32 to vector<16x16xf32>
    %88 = arith.mulf %86, %87 : vector<16x16xf32>
    %89 = arith.addf %88, %13 : vector<16x16xf32>
    %cst_40 = arith.constant dense<0xFF800000> : vector<16xf32>
    %90 = vector.multi_reduction <maximumf>, %89, %cst_40 [1] : vector<16x16xf32> to vector<16xf32>
    %91 = vector.shape_cast %90 : vector<16xf32> to vector<16x1xf32>
    %92 = vector.broadcast %91 : vector<16x1xf32> to vector<16x16xf32>
    %93 = arith.subf %89, %92 : vector<16x16xf32>
    %94 = math.exp %93 : vector<16x16xf32>
    %cst_41 = arith.constant dense<0.000000e+00> : vector<16xf32>
    %95 = vector.multi_reduction <add>, %94, %cst_41 [1] : vector<16x16xf32> to vector<16xf32>
    %96 = vector.shape_cast %95 : vector<16xf32> to vector<16x1xf32>
    %97 = tpu.reciprocal %96 {approx = true} : vector<16x1xf32> -> vector<16x1xf32>
    %98 = arith.mulf %96, %97 : vector<16x1xf32>
    %cst_42 = arith.constant 2.000000e+00 : f32
    %99 = vector.broadcast %cst_42 : f32 to vector<16x1xf32>
    %100 = arith.subf %99, %98 : vector<16x1xf32>
    %101 = arith.mulf %97, %100 : vector<16x1xf32>
    %102 = vector.broadcast %101 : vector<16x1xf32> to vector<16x16xf32>
    %103 = arith.mulf %94, %102 : vector<16x16xf32>
    %cst_43 = arith.constant dense<0.000000e+00> : vector<16x8xf32>
    %104 = tpu.matmul %103, %85, %cst_43 {dimension_numbers = #tpu.dot_dimension_numbers<[1], [0], [0], [1], [0, 0, 1, 1], [], []>} : vector<16x16xf32>, vector<16x8xf32>, vector<16x8xf32> -> vector<16x8xf32>
    %105 = vector.extract_strided_slice %38 {offsets = [0, 24], sizes = [16, 8], strides = [1, 1]} : vector<16x96xf32> to vector<16x8xf32>
    %106 = vector.extract_strided_slice %38 {offsets = [0, 56], sizes = [16, 8], strides = [1, 1]} : vector<16x96xf32> to vector<16x8xf32>
    %107 = vector.extract_strided_slice %38 {offsets = [0, 88], sizes = [16, 8], strides = [1, 1]} : vector<16x96xf32> to vector<16x8xf32>
    %cst_44 = arith.constant dense<0.000000e+00> : vector<16x16xf32>
    %108 = tpu.matmul %105, %106, %cst_44 {dimension_numbers = #tpu.dot_dimension_numbers<[1], [1], [0], [0], [0, 0, 1, 0], [], []>} : vector<16x8xf32>, vector<16x8xf32>, vector<16x16xf32> -> vector<16x16xf32>
    %cst_45 = arith.constant 0.353553385 : f32
    %109 = vector.broadcast %cst_45 : f32 to vector<16x16xf32>
    %110 = arith.mulf %108, %109 : vector<16x16xf32>
    %111 = arith.addf %110, %13 : vector<16x16xf32>
    %cst_46 = arith.constant dense<0xFF800000> : vector<16xf32>
    %112 = vector.multi_reduction <maximumf>, %111, %cst_46 [1] : vector<16x16xf32> to vector<16xf32>
    %113 = vector.shape_cast %112 : vector<16xf32> to vector<16x1xf32>
    %114 = vector.broadcast %113 : vector<16x1xf32> to vector<16x16xf32>
    %115 = arith.subf %111, %114 : vector<16x16xf32>
    %116 = math.exp %115 : vector<16x16xf32>
    %cst_47 = arith.constant dense<0.000000e+00> : vector<16xf32>
    %117 = vector.multi_reduction <add>, %116, %cst_47 [1] : vector<16x16xf32> to vector<16xf32>
    %118 = vector.shape_cast %117 : vector<16xf32> to vector<16x1xf32>
    %119 = tpu.reciprocal %118 {approx = true} : vector<16x1xf32> -> vector<16x1xf32>
    %120 = arith.mulf %118, %119 : vector<16x1xf32>
    %cst_48 = arith.constant 2.000000e+00 : f32
    %121 = vector.broadcast %cst_48 : f32 to vector<16x1xf32>
    %122 = arith.subf %121, %120 : vector<16x1xf32>
    %123 = arith.mulf %119, %122 : vector<16x1xf32>
    %124 = vector.broadcast %123 : vector<16x1xf32> to vector<16x16xf32>
    %125 = arith.mulf %116, %124 : vector<16x16xf32>
    %cst_49 = arith.constant dense<0.000000e+00> : vector<16x8xf32>
    %126 = tpu.matmul %125, %107, %cst_49 {dimension_numbers = #tpu.dot_dimension_numbers<[1], [0], [0], [1], [0, 0, 1, 1], [], []>} : vector<16x16xf32>, vector<16x8xf32>, vector<16x8xf32> -> vector<16x8xf32>
    %127 = tpu.concatenate %60, %82, %104, %126 in 1 : vector<16x8xf32>, vector<16x8xf32>, vector<16x8xf32>, vector<16x8xf32> -> vector<16x32xf32>
    %cst_50 = arith.constant dense<0.000000e+00> : vector<16x32xf32>
    %128 = tpu.matmul %127, %2, %cst_50 {dimension_numbers = #tpu.dot_dimension_numbers<[1], [0], [0], [1], [0, 0, 1, 1], [], []>} : vector<16x32xf32>, vector<32x32xf32>, vector<16x32xf32> -> vector<16x32xf32>
    %129 = vector.broadcast %10 : vector<1x32xf32> to vector<16x32xf32>
    %130 = arith.addf %128, %129 : vector<16x32xf32>
    %131 = arith.addf %0, %130 : vector<16x32xf32>
    %cst_51 = arith.constant dense<0.000000e+00> : vector<16xf32>
    %132 = vector.multi_reduction <add>, %131, %cst_51 [1] : vector<16x32xf32> to vector<16xf32>
    %133 = vector.shape_cast %132 : vector<16xf32> to vector<16x1xf32>
    %cst_52 = arith.constant 3.200000e+01 : f32
    %134 = vector.broadcast %cst_52 : f32 to vector<16x1xf32>
    %135 = arith.divf %133, %134 : vector<16x1xf32>
    %136 = vector.broadcast %135 : vector<16x1xf32> to vector<16x32xf32>
    %137 = arith.subf %131, %136 : vector<16x32xf32>
    %138 = arith.mulf %137, %137 : vector<16x32xf32>
    %cst_53 = arith.constant dense<0.000000e+00> : vector<16xf32>
    %139 = vector.multi_reduction <add>, %138, %cst_53 [1] : vector<16x32xf32> to vector<16xf32>
    %140 = vector.shape_cast %139 : vector<16xf32> to vector<16x1xf32>
    %cst_54 = arith.constant 3.200000e+01 : f32
    %141 = vector.broadcast %cst_54 : f32 to vector<16x1xf32>
    %142 = arith.divf %140, %141 : vector<16x1xf32>
    %143 = vector.broadcast %135 : vector<16x1xf32> to vector<16x32xf32>
    %144 = arith.subf %131, %143 : vector<16x32xf32>
    %cst_55 = arith.constant 9.99999974E-6 : f32
    %145 = vector.broadcast %cst_55 : f32 to vector<16x1xf32>
    %146 = arith.addf %142, %145 : vector<16x1xf32>
    %147 = math.rsqrt %146 : vector<16x1xf32>
    %148 = vector.broadcast %147 : vector<16x1xf32> to vector<16x32xf32>
    %149 = arith.mulf %144, %148 : vector<16x32xf32>
    %150 = vector.broadcast %7 : vector<1x32xf32> to vector<16x32xf32>
    %151 = arith.mulf %149, %150 : vector<16x32xf32>
    %152 = vector.broadcast %8 : vector<1x32xf32> to vector<16x32xf32>
    %153 = arith.addf %151, %152 : vector<16x32xf32>
    %cst_56 = arith.constant dense<0.000000e+00> : vector<16x128xf32>
    %154 = tpu.matmul %153, %3, %cst_56 {dimension_numbers = #tpu.dot_dimension_numbers<[1], [0], [0], [1], [0, 0, 1, 1], [], []>} : vector<16x32xf32>, vector<32x128xf32>, vector<16x128xf32> -> vector<16x128xf32>
    %155 = vector.broadcast %11 : vector<1x128xf32> to vector<16x128xf32>
    %156 = arith.addf %154, %155 : vector<16x128xf32>
    %cst_57 = arith.constant 5.000000e-01 : f32
    %157 = vector.broadcast %cst_57 : f32 to vector<16x128xf32>
    %158 = arith.mulf %157, %156 : vector<16x128xf32>
    %cst_58 = arith.constant 1.41421354 : f32
    %159 = vector.broadcast %cst_58 : f32 to vector<16x128xf32>
    %160 = arith.divf %156, %159 : vector<16x128xf32>
    %161 = math.erf %160 : vector<16x128xf32>
    %cst_59 = arith.constant 1.000000e+00 : f32
    %162 = vector.broadcast %cst_59 : f32 to vector<16x128xf32>
    %163 = arith.addf %162, %161 : vector<16x128xf32>
    %164 = arith.mulf %158, %163 : vector<16x128xf32>
    %cst_60 = arith.constant dense<0.000000e+00> : vector<16x32xf32>
    %165 = tpu.matmul %164, %4, %cst_60 {dimension_numbers = #tpu.dot_dimension_numbers<[1], [1], [0], [0], [0, 0, 1, 0], [], []>} : vector<16x128xf32>, vector<32x128xf32>, vector<16x32xf32> -> vector<16x32xf32>
    %166 = vector.broadcast %12 : vector<1x32xf32> to vector<16x32xf32>
    %167 = arith.addf %165, %166 : vector<16x32xf32>
    %168 = arith.addf %131, %167 : vector<16x32xf32>
    %c0_61 = arith.constant 0 : index
    %c0_62 = arith.constant 0 : index
    %169 = vector.load %arg3[%c0_61, %c0_62] : memref<16x32xf32, #tpu.memory_space<vmem>>, vector<16x32xf32>
    tpu.vector_store %arg3[%c0_61, %c0_62], %168 {strides = array<i32>} : memref<16x32xf32, #tpu.memory_space<vmem>>, vector<16x32xf32>,
    return
  }
  func.func @transform_0(%arg0: i32) -> (i32, i32) {
    %c0_i32 = arith.constant 0 : i32
    %c0_i32_0 = arith.constant 0 : i32
    %c0_i32_1 = arith.constant 0 : i32
    return %c0_i32, %c0_i32_0 : i32, i32
  }
  func.func @transform_1(%arg0: i32) -> (i32, i32) {
    %c0_i32 = arith.constant 0 : i32
    %c0_i32_0 = arith.constant 0 : i32
    %c0_i32_1 = arith.constant 0 : i32
    return %c0_i32, %c0_i32_0 : i32, i32
  }
  func.func @transform_2(%arg0: i32) -> (i32, i32) {
    %c0_i32 = arith.constant 0 : i32
    %c0_i32_0 = arith.constant 0 : i32
    %c0_i32_1 = arith.constant 0 : i32
    return %c0_i32, %c0_i32_0 : i32, i32
  }
}

</mosaic_0001>

<bundles_post_ra>
// kernel: tpu_custom_call.1
= control target key start
LH: loop header
LB: loop body
LE: loop exit
PB: predicated region body
PF: predicated region fallthrough
CT: control target
= control target key end

     0   :  { %7 = vsyncpa [#allocation3], 0  ;;  %s2009_s0 = inlined_call_operand.hbm [shape: f32[16,32], index: 0, kind: input, shape index: {}]   ;;  %s2010_s1 = inlined_call_operand.hbm [shape: f32[64,512], index: 1, kind: input, shape index: {}]   ;;  %s2011_s2 = inlined_call_operand.hbm [shape: f32[16,32], index: 2, kind: output, shape index: {}]  }
   0x1   :  { %8 = vsyncpa [#allocation6], 0 }
   0x2   :  { %9 = vsyncpa [#allocation4], 0  ;;  %s1788_s9 = smov [#allocation2]   ;;  %s1716_s13 = scalar_lea.hbm %s2009_s0, 256 }
   0x3   :  { %s15_s10 = sshll.u32 %s1788_s9, 4  ;;  %p1717_p0 = scmp.ne.s32.totalorder %s2009_s0, %s1716_s13  ;;  %s16_s10 = int_to_ptr.vmem [resolvable:$true] %s15_s10 }
   0x4   :  { %p1720_p1 = scmp.lt.u32.totalorder %s1716_s13, %s2009_s0 }
   0x6   :  { %p1722_p2 = pnand %p1720_p1, %p1717_p0 }
   0x8   :  { %1725 = shalt.err (!%p1722_p2)
}
   0x9   :  { %s1726_s18 = scalar_lea.vmem %s16_s10, 256  ;;  %p1731_p4 = scmp.lt.s32.totalorder %s16_s10, %s16_s10 }
   0xa   :  { %p1727_p3 = scmp.ne.s32.totalorder %s16_s10, %s1726_s18  ;;  %p1732_p5 = scmp.lt.s32.totalorder %s1726_s18, %s1726_s18 }
   0xc   :  { %p1733_p6 = por %p1732_p5, %p1731_p4 }
   0xe   :  { %p1734_p7 = pnand %p1733_p6, %p1727_p3 }
  0x10   :  { %1737 = shalt.err (!%p1734_p7)
}
  0x11   :  { %s1789_s19 = smov 128   ;;  %s1790_s20 = smov 8  }
  0x12   :  { %21 = dma.hbm_to_vmem [thread:$0]  %s2009_s0, 256, %s16_s10, [#allocation3], %s1789_s19, %s1789_s19, %s1790_s20  }
  0x13   :  { %s1791_s23 = smov [#allocation5]   ;;  %s1738_s27 = scalar_lea.hbm %s2010_s1, 4096 }
  0x14   :  { %s27_s24 = sshll.u32 %s1791_s23, 4  ;;  %p1739_p8 = scmp.ne.s32.totalorder %s2010_s1, %s1738_s27  ;;  %s28_s24 = int_to_ptr.vmem [resolvable:$true] %s27_s24 }
  0x15   :  { %p1742_p9 = scmp.lt.u32.totalorder %s1738_s27, %s2010_s1 }
  0x17   :  { %p1744_p10 = pnand %p1742_p9, %p1739_p8 }
  0x19   :  { %1747 = shalt.err (!%p1744_p10)
}
  0x1a   :  { %s1748_s4 = scalar_lea.vmem %s28_s24, 4096  ;;  %p1753_p12 = scmp.lt.s32.totalorder %s28_s24, %s28_s24 }
  0x1b   :  { %p1749_p11 = scmp.ne.s32.totalorder %s28_s24, %s1748_s4  ;;  %p1754_p13 = scmp.lt.s32.totalorder %s1748_s4, %s1748_s4 }
  0x1d   :  { %p1755_p0 = por %p1754_p13, %p1753_p12 }
  0x1f   :  { %p1756_p1 = pnand %p1755_p0, %p1749_p11 }
  0x21   :  { %1759 = shalt.err (!%p1756_p1)
}
  0x22   :  { %s1792_s0 = smov 512   ;;  %s1793_s5 = smov 32  }
  0x23   :  { %33 = dma.hbm_to_vmem [thread:$0]  %s2010_s1, 4096, %s28_s24, [#allocation6], %s1792_s0, %s1792_s0, %s1793_s5  }
  0x24   :  { %1782 = dma.done.wait [#allocation3], 256  }
  0x25   :  { %1783 = vsyncadd [#allocation3], 4294967040 }
  0x26   :  { %1784 = dma.done.wait [#allocation6], 4096  }
  0x27   :  { %1785 = vsyncadd [#allocation6], 4294963200  ;;  %vm68_vm0 = vcmask 261120   ;;  %v1850_v0 = vld [vmem:[#allocation2] sm:$0xff]  ;;  %v1852_v1 = vld [vmem:[#allocation2 + $0x8] sm:$0xff]  ;;  %vm187_vm1 = vcmask 64512  }
  0x28   :  { %v69_v2 = vsel %vm68_vm0, %v1850_v0, 0.0  ;;  %v72_v3 = vsel %vm68_vm0, %v1852_v1, 0.0  ;;  %v42_v14 = vld [vmem:[#allocation5] sm:$0xff]  ;;  %v59_v29 = vld [vmem:[#allocation5 + $0x88] ss:$0 sm:$0xff]  ;;  %s1794_s1 = smov 88   ;;  %vm1880_vm2 = vmpackc.low %vm187_vm1, %vm187_vm1 }
  0x29   :  { %70 = vadd.xlane.f32.xlu0 %v69_v2  ;;  %v43_v15 = vld [vmem:[#allocation5 + $0x20] sm:$0xff]  ;;  %s1795_s8 = smov 96   ;;  %s1796_s9 = smov 120   ;;  %vm275_vm3 = vcmask 130048   ;;  %vm1049_vm4 = vcmask 195584  }
  0x2a   :  { %v44_v16 = vld [vmem:[#allocation5 + $0x40] sm:$0xff]  ;;  %v1540_v17 = vpack.c.bf16 %v43_v15, %v42_v14  ;;  %s1797_s10 = smov 56   ;;  %s1798_s11 = smov 64  }
  0x2b   :  { %v45_v18 = vld [vmem:[#allocation5 + $0x60] sm:$0xff]  ;;  %s1799_s12 = smov 80   ;;  %s1800_s13 = smov 112  }
  0x2c   :  { %v1544_v19 = vpack.c.bf16 %v45_v18, %v44_v16  ;;  %1541 = vmatprep.subr.bf16.mxu1 %v1540_v17  ;;  %v58_v27 = vld [vmem:[#allocation5 + $0x80] ss:$0 sm:$0xff]  ;;  %s1801_s14 = smov 48   ;;  %s1802_s15 = smov 104  }
  0x2d   :  { %73 = vadd.xlane.f32.xlu0 %v72_v3  ;;  %1543 = vmatpush3.bf16.msra.mxu1 %v1540_v17  ;;  %v62_v36 = vld [vmem:[#allocation5 + $0xa0] ss:$0 sm:$0xff]  ;;  %s1803_s16 = smov 72   ;;  %s1804_s17 = smov 40  }
  0x2e   :  { %1545 = vmatprep.subr.bf16.mxu1 %v1544_v19  ;;  %v1896_v54 = vld [vmem:[#allocation5 + $0xe0] sm:$0xff]  ;;  %s1805_s18 = smov 16   ;;  %s1806_s21 = smov 24  }
  0x2f   :  { %v1898_v57 = vld [vmem:[#allocation5 + $0xc0] sm:$0xff]  ;;  %s1807_s22 = smov [#allocation7]  }
  0x30   :  { %s1341_s23 = sshll.u32 %s1807_s22, 4  ;;  %s1342_s23 = int_to_ptr.vmem [resolvable:$true] %s1341_s23 }
  0x31   :  { %1547 = vmatpush3.bf16.msra.mxu1 %v1544_v19  ;;  %s1760_s24 = scalar_lea.vmem %s1342_s23, 256  ;;  %p1765_p3 = scmp.lt.s32.totalorder %s1342_s23, %s1342_s23 }
  0x32   :  { %p1761_p2 = scmp.ne.s32.totalorder %s1342_s23, %s1760_s24  ;;  %p1766_p4 = scmp.lt.s32.totalorder %s1760_s24, %s1760_s24 }
  0x34   :  { %p1767_p5 = por %p1766_p4, %p1765_p3 }
  0x36   :  { %p1768_p6 = pnand %p1767_p5, %p1761_p2 }
  0xb6   :  { %v71_v4 = vpop.xlane.xlu0 %70 }
  0xb7   :  { %v76_v5 = vmul.f32 0.03125, %v71_v4 }
  0xb9   :  { %v78_v6 = vsub.f32 %v1850_v0, %v76_v5 }
  0xba   :  { %v74_v7 = vpop.xlane.xlu0 %73 }
  0xbb   :  { %v77_v8 = vmul.f32 0.03125, %v74_v7  ;;  %v80_v9 = vmul.f32 %v78_v6, %v78_v6 }
  0xbd   :  { %v79_v10 = vsub.f32 %v1852_v1, %v77_v8  ;;  %v82_v11 = vsel %vm68_vm0, %v80_v9, 0.0 }
  0xbe   :  { %83 = vadd.xlane.f32.xlu1 %v82_v11 }
  0xbf   :  { %v81_v12 = vmul.f32 %v79_v10, %v79_v10 }
  0xc1   :  { %v85_v13 = vsel %vm68_vm0, %v81_v12, 0.0 }
  0xc2   :  { %86 = vadd.xlane.f32.xlu1 %v85_v13 }
 0x14b   :  { %v84_v20 = vpop.xlane.xlu1 %83 }
 0x14c   :  { %v88_v21 = vmul.f32 0.03125, %v84_v20 }
 0x14e   :  { %v90_v22 = vadd.f32 1e-05, %v88_v21 }
 0x14f   :  { %v87_v23 = vpop.xlane.xlu1 %86 }
 0x150   :  { %1672 = vrsqrt.f32 %v90_v22  ;;  %v89_v24 = vmul.f32 0.03125, %v87_v23 }
 0x152   :  { %v91_v25 = vadd.f32 1e-05, %v89_v24 }
 0x154   :  { %1674 = vrsqrt.f32 %v91_v25 }
 0x15a   :  { %v1673_v26 = vpop.eup %1672 }
 0x15b   :  { %v94_v28 = vmul.f32 %v1673_v26, %v78_v6 }
 0x15d   :  { %v96_v30 = vmul.f32 %v94_v28, %v58_v27 }
 0x15e   :  { %v1675_v31 = vpop.eup %1674 }
 0x15f   :  { %v95_v32 = vmul.f32 %v1675_v31, %v79_v10  ;;  %v98_v33 = vadd.f32 %v96_v30, %v59_v29 }
 0x161   :  { %v97_v34 = vmul.f32 %v95_v32, %v58_v27  ;;  %1448 = vmatprep.mubr.msk.f32.mxu1 %vm68_vm0, %v98_v33 }
 0x163   :  { %v99_v35 = vadd.f32 %v97_v34, %v59_v29 }
 0x165   :  { %1449 = vmatmul.mubr.msk.f32.vlgmr.msra.gmra.mrb[0].mxu1 %vm68_vm0, %v99_v35 }
 0x238   :  { %v1450_v37 = vpop.f32.mrb[0].mxu1 }
 0x239   :  { %v1864_v38 = vadd.f32 %v1450_v37, %v62_v36  ;;  %v172_v39 = vpop.f32.mrb[1].mxu1 }
 0x23a   :  { %v1866_v40 = vadd.f32 %v172_v39, %v62_v36 }
 0x23c   :  { %1455 = vmatprep.mubr.msk.f32.mxu1 %vm187_vm1, %v1866_v40  ;;  %v1872_v41 = vpack.i.bf16 %v1864_v38, %v1866_v40 }
 0x23e   :  { %1638 = vrot.lane.b32.xlu1 %v1872_v41, %s1794_s1  ;;  %1633 = vrot.lane.b32.xlu0 %v1872_v41, %s1795_s8 }
 0x242   :  { %391 = vrot.lane.b32.xlu1 %v1866_v40, %s1796_s9 }
 0x246   :  { %393 = vrot.lane.b32.xlu1 %v1864_v38, %s1796_s9 }
 0x2b0   :  { %v1639_v42 = vpop.permute.xlu1 %1638  ;;  %v1634_v43 = vpop.permute.xlu0 %1633 }
 0x2b1   :  { %v1641_v44 = vunpack.i.h.bf16 %v1639_v42  ;;  %v1640_v45 = vunpack.i.l.bf16 %v1639_v42  ;;  %v1636_v46 = vunpack.i.h.bf16 %v1634_v43  ;;  %v1635_v47 = vunpack.i.l.bf16 %v1634_v43 }
 0x2b3   :  { %v1548_v49 = vpack.c.bf16 %v1636_v46, %v1635_v47  ;;  %v1558_v50 = vpack.c.bf16 %v1641_v44, %v1640_v45 }
 0x2b4   :  { %v392_v51 = vpop.permute.xlu1 %391 }
 0x2b5   :  { %1550 = vmatprep.subr.msk.bf16.mxu1 %vm1880_vm2, %v1548_v49 }
 0x2b6   :  { %1553 = vmatpush3.bf16.xpose.msk.msra.mxu1 %vm1880_vm2, %v1548_v49 }
 0x2b7   :  { %1560 = vmatprep.subr.msk.bf16.mxu1 %vm1880_vm2, %v1558_v50 }
 0x2b8   :  { %v394_v52 = vpop.permute.xlu1 %393 }
 0x2bd   :  { %1456 = vmatmul.mubr.msk.f32.vlgmr.msra.gmra.mrb[2].mxu1 %vm187_vm1, %v1864_v38 }
 0x2be   :  { %1563 = vmatpush3.bf16.xpose.msk.msra.mxu1 %vm1880_vm2, %v1558_v50  ;;  %1469 = vmatprep.mubr.msk.f32.mxu1 %vm187_vm1, %v392_v51 }
 0x2c5   :  { %1470 = vmatmul.mubr.msk.f32.vlgmr.msra.gmra.mrb[4].mxu1 %vm187_vm1, %v394_v52 }
 0x390   :  { %v1457_v53 = vpop.f32.mrb[2].mxu1 }
 0x391   :  { %v272_v55 = vmul.f32 0.35355338, %v1457_v53  ;;  %v262_v56 = vpop.f32.mrb[3].mxu1 }
 0x392   :  { %v271_v58 = vmul.f32 0.35355338, %v262_v56 }
 0x393   :  { %v274_v59 = vadd.f32 %v272_v55, %v1896_v54 }
 0x394   :  { %v273_v60 = vadd.f32 %v271_v58, %v1898_v57 }
 0x395   :  { %v279_v61 = vsel %vm275_vm3, %v274_v59, -inf }
 0x396   :  { %280 = vmax.xlane.f32.xlu1 %v279_v61  ;;  %v276_v62 = vsel %vm275_vm3, %v273_v60, -inf }
 0x397   :  { %277 = vmax.xlane.f32.xlu0 %v276_v62 }
 0x398   :  { %v1471_v63 = vpop.f32.mrb[4].mxu1 }
 0x399   :  { %v473_v2 = vpop.f32.mrb[5].mxu1  ;;  %v483_v3 = vmul.f32 0.35355338, %v1471_v63 }
 0x39a   :  { %v482_v4 = vmul.f32 0.35355338, %v473_v2 }
 0x39b   :  { %v485_v7 = vadd.f32 %v483_v3, %v1896_v54 }
 0x39c   :  { %v484_v5 = vadd.f32 %v482_v4, %v1898_v57 }
 0x39d   :  { %v489_v8 = vsel %vm275_vm3, %v485_v7, -inf }
 0x39e   :  { %v486_v6 = vsel %vm275_vm3, %v484_v5, -inf }
 0x39f   :  { %487 = vmax.xlane.f32.xlu0 %v486_v6 }
 0x3a3   :  { %490 = vmax.xlane.f32.xlu0 %v489_v8 }
 0x423   :  { %v281_v9 = vpop.xlane.xlu1 %280 }
 0x424   :  { %v283_v10 = vsub.f32 %v274_v59, %v281_v9  ;;  %v278_v11 = vpop.xlane.xlu0 %277 }
 0x425   :  { %v282_v12 = vsub.f32 %v273_v60, %v278_v11 }
 0x426   :  { %v286_v13 = vmul.f32 1.442695, %v283_v10 }
 0x427   :  { %v284_v14 = vmul.f32 1.442695, %v282_v12 }
 0x428   :  { %1676 = vpow2.f32 %v286_v13 }
 0x429   :  { %1678 = vpow2.f32 %v284_v14 }
 0x42c   :  { %v488_v15 = vpop.xlane.xlu0 %487 }
 0x42d   :  { %v492_v16 = vsub.f32 %v484_v5, %v488_v15 }
 0x42f   :  { %v494_v17 = vmul.f32 1.442695, %v492_v16 }
 0x430   :  { %v491_v18 = vpop.xlane.xlu0 %490 }
 0x431   :  { %1680 = vpow2.f32 %v494_v17  ;;  %v493_v19 = vsub.f32 %v485_v7, %v491_v18 }
 0x432   :  { %v1677_v20 = vpop.eup %1676 }
 0x433   :  { %v1679_v21 = vpop.eup %1678  ;;  %v496_v22 = vmul.f32 1.442695, %v493_v19  ;;  %v291_v23 = vsel %vm275_vm3, %v1677_v20, 0.0 }
 0x434   :  { %292 = vadd.xlane.f32.xlu1 %v291_v23  ;;  %v288_v24 = vsel %vm275_vm3, %v1679_v21, 0.0 }
 0x435   :  { %1682 = vpow2.f32 %v496_v22  ;;  %289 = vadd.xlane.f32.xlu0 %v288_v24 }
 0x43b   :  { %v1681_v25 = vpop.eup %1680 }
 0x43c   :  { %v498_v26 = vsel %vm275_vm3, %v1681_v25, 0.0 }
 0x43d   :  { %499 = vadd.xlane.f32.xlu0 %v498_v26 }
 0x43f   :  { %v1683_v27 = vpop.eup %1682 }
 0x440   :  { %v501_v28 = vsel %vm275_vm3, %v1683_v27, 0.0 }
 0x441   :  { %502 = vadd.xlane.f32.xlu1 %v501_v28 }
 0x452   :  { %1648 = vrot.lane.b32.xlu1 %v1872_v41, %s1797_s10 }
 0x453   :  { %1643 = vrot.lane.b32.xlu0 %v1872_v41, %s1798_s11 }
 0x456   :  { %1653 = vrot.lane.b32.xlu1 %v1872_v41, %s1799_s12 }
 0x457   :  { %603 = vrot.lane.b32.xlu0 %v1864_v38, %s1800_s13 }
 0x45a   :  { %601 = vrot.lane.b32.xlu1 %v1866_v40, %s1800_s13 }
 0x4c1   :  { %v293_v29 = vpop.xlane.xlu1 %292 }
 0x4c2   :  { %1684 = vrcp.f32 %v293_v29  ;;  %v290_v30 = vpop.xlane.xlu0 %289 }
 0x4c3   :  { %1686 = vrcp.f32 %v290_v30 }
 0x4ca   :  { %v500_v31 = vpop.xlane.xlu0 %499 }
 0x4cb   :  { %1688 = vrcp.f32 %v500_v31 }
 0x4cc   :  { %v1685_v32 = vpop.eup %1684 }
 0x4cd   :  { %v1687_v33 = vpop.eup %1686  ;;  %v297_v34 = vmul.f32 %v1685_v32, %v293_v29 }
 0x4ce   :  { %v296_v35 = vmul.f32 %v1687_v33, %v290_v30  ;;  %v503_v36 = vpop.xlane.xlu1 %502  ;;  %v1644_v37 = vpop.permute.xlu0 %1643 }
 0x4cf   :  { %v299_v39 = vsub.f32 2.0, %v297_v34  ;;  %1690 = vrcp.f32 %v503_v36  ;;  %v1646_v42 = vunpack.i.h.bf16 %v1644_v37  ;;  %v1645_v43 = vunpack.i.l.bf16 %v1644_v37 }
 0x4d0   :  { %v298_v44 = vsub.f32 2.0, %v296_v35 }
 0x4d1   :  { %v301_v45 = vmul.f32 %v1685_v32, %v299_v39  ;;  %v1554_v46 = vpack.c.bf16 %v1646_v42, %v1645_v43 }
 0x4d2   :  { %v1649_v47 = vpop.permute.xlu1 %1648  ;;  %v300_v49 = vmul.f32 %v1687_v33, %v298_v44  ;;  %v604_v10 = vpop.permute.xlu0 %603 }
 0x4d3   :  { %v1651_v50 = vunpack.i.h.bf16 %v1649_v47  ;;  %v1650_v51 = vunpack.i.l.bf16 %v1649_v47  ;;  %1555 = vmatprep.subr.bf16.mxu0 %v1554_v46  ;;  %v303_v55 = vmul.f32 %v1677_v20, %v301_v45 }
 0x4d4   :  { %1557 = vmatpush3.bf16.msra.mxu0 %v1554_v46  ;;  %v302_v52 = vmul.f32 %v1679_v21, %v300_v49 }
 0x4d5   :  { %v1689_v53 = vpop.eup %1688  ;;  %v1564_v56 = vpack.c.bf16 %v1651_v50, %v1650_v51 }
 0x4d6   :  { %v506_v58 = vmul.f32 %v1689_v53, %v500_v31  ;;  %v1654_v59 = vpop.permute.xlu1 %1653  ;;  %1462 = vmatprep.mubr.msk.f32.mxu0 %vm275_vm3, %v302_v52 }
 0x4d7   :  { %v1656_v60 = vunpack.i.h.bf16 %v1654_v59  ;;  %v1655_v61 = vunpack.i.l.bf16 %v1654_v59  ;;  %1463 = vmatmul.mubr.msk.f32.vlgmr.msra.gmra.mrb[0].mxu0 %vm275_vm3, %v303_v55  ;;  %1565 = vmatprep.subr.bf16.mxu0 %v1564_v56 }
 0x4d8   :  { %v508_v62 = vsub.f32 2.0, %v506_v58  ;;  %1567 = vmatpush3.bf16.msra.mxu0 %v1564_v56 }
 0x4d9   :  { %v1691_v63 = vpop.eup %1690  ;;  %v1568_v2 = vpack.c.bf16 %v1656_v60, %v1655_v61 }
 0x4da   :  { %v510_v3 = vmul.f32 %v1689_v53, %v508_v62  ;;  %v507_v4 = vmul.f32 %v1691_v63, %v503_v36  ;;  %v602_v9 = vpop.permute.xlu1 %601 }
 0x4db   :  { %1570 = vmatprep.subr.msk.bf16.mxu0 %vm1880_vm2, %v1568_v2 }
 0x4dc   :  { %v512_v5 = vmul.f32 %v1681_v25, %v510_v3  ;;  %v509_v6 = vsub.f32 2.0, %v507_v4 }
 0x4de   :  { %v511_v7 = vmul.f32 %v1691_v63, %v509_v6  ;;  %1476 = vmatprep.mubr.msk.f32.mxu0 %vm275_vm3, %v512_v5 }
 0x4e0   :  { %v513_v8 = vmul.f32 %v1683_v27, %v511_v7 }
 0x4e2   :  { %1477 = vmatmul.mubr.msk.f32.vlgmr.msra.gmra.mrb[2].mxu0 %vm275_vm3, %v513_v8 }
 0x4e3   :  { %1573 = vmatpush3.bf16.xpose.msk.msra.mxu0 %vm1880_vm2, %v1568_v2  ;;  %1483 = vmatprep.mubr.msk.f32.mxu0 %vm187_vm1, %v602_v9 }
 0x4ea   :  { %1484 = vmatmul.mubr.msk.f32.vlgmr.msra.gmra.mrb[4].mxu0 %vm187_vm1, %v604_v10 }
 0x5aa   :  { %v1927_v11 = vpop.f32.mrb[0].mxu0 }
 0x5ab   :  { %v1929_v12 = vpop.f32.mrb[1].mxu0 }
 0x5b5   :  { %v1931_v13 = vpop.f32.mrb[2].mxu0 }
 0x5b6   :  { %v1933_v14 = vpop.f32.mrb[3].mxu0 }
 0x5bd   :  { %v1485_v15 = vpop.f32.mrb[4].mxu0 }
 0x5be   :  { %v693_v16 = vmul.f32 0.35355338, %v1485_v15  ;;  %v683_v17 = vpop.f32.mrb[5].mxu0 }
 0x5bf   :  { %v692_v18 = vmul.f32 0.35355338, %v683_v17 }
 0x5c0   :  { %v695_v19 = vadd.f32 %v693_v16, %v1896_v54 }
 0x5c1   :  { %v694_v20 = vadd.f32 %v692_v18, %v1898_v57 }
 0x5c2   :  { %v699_v21 = vsel %vm275_vm3, %v695_v19, -inf }
 0x5c3   :  { %700 = vmax.xlane.f32.xlu0 %v699_v21  ;;  %v696_v22 = vsel %vm275_vm3, %v694_v20, -inf }
 0x5c4   :  { %697 = vmax.xlane.f32.xlu1 %v696_v22 }
 0x5d5   :  { %1658 = vrot.lane.b32.xlu1 %v1872_v41, %s1801_s14 }
 0x5d9   :  { %811 = vrot.lane.b32.xlu1 %v1866_v40, %s1802_s15 }
 0x5dd   :  { %813 = vrot.lane.b32.xlu1 %v1864_v38, %s1802_s15 }
 0x650   :  { %v701_v23 = vpop.xlane.xlu0 %700 }
 0x651   :  { %v703_v24 = vsub.f32 %v695_v19, %v701_v23  ;;  %v698_v25 = vpop.xlane.xlu1 %697 }
 0x652   :  { %v702_v26 = vsub.f32 %v694_v20, %v698_v25 }
 0x653   :  { %v706_v27 = vmul.f32 1.442695, %v703_v24 }
 0x654   :  { %v704_v28 = vmul.f32 1.442695, %v702_v26 }
 0x655   :  { %1692 = vpow2.f32 %v706_v27  ;;  %v1659_v29 = vpop.permute.xlu1 %1658 }
 0x656   :  { %v1661_v30 = vunpack.i.h.bf16 %v1659_v29  ;;  %v1660_v31 = vunpack.i.l.bf16 %v1659_v29  ;;  %1694 = vpow2.f32 %v704_v28 }
 0x658   :  { %v1574_v32 = vpack.c.bf16 %v1661_v30, %v1660_v31 }
 0x659   :  { %v812_v56 = vpop.permute.xlu1 %811 }
 0x65a   :  { %1575 = vmatprep.subr.bf16.mxu1 %v1574_v32 }
 0x65b   :  { %1577 = vmatpush3.bf16.msra.mxu1 %v1574_v32  ;;  %v46_v32 = vld [vmem:[#allocation5 + $0x8] sm:$0xff] }
 0x65d   :  { %v814_v58 = vpop.permute.xlu1 %813 }
 0x65f   :  { %v1693_v33 = vpop.eup %1692 }
 0x660   :  { %v711_v34 = vsel %vm275_vm3, %v1693_v33, 0.0  ;;  %v1695_v40 = vpop.eup %1694 }
 0x661   :  { %712 = vadd.xlane.f32.xlu0 %v711_v34  ;;  %v708_v38 = vsel %vm275_vm3, %v1695_v40, 0.0 }
 0x665   :  { %709 = vadd.xlane.f32.xlu0 %v708_v38 }
 0x67b   :  { %1663 = vrot.lane.b32.xlu0 %v1872_v41, %s1803_s16 }
 0x6ee   :  { %v713_v35 = vpop.xlane.xlu0 %712 }
 0x6ef   :  { %1696 = vrcp.f32 %v713_v35 }
 0x6f2   :  { %v710_v36 = vpop.xlane.xlu0 %709 }
 0x6f3   :  { %1698 = vrcp.f32 %v710_v36 }
 0x6f6   :  { %v1664_v37 = vpop.permute.xlu0 %1663 }
 0x6f7   :  { %v1666_v39 = vunpack.i.h.bf16 %v1664_v37  ;;  %v1665_v42 = vunpack.i.l.bf16 %v1664_v37 }
 0x6f9   :  { %v1697_v43 = vpop.eup %1696  ;;  %v1578_v44 = vpack.c.bf16 %v1666_v39, %v1665_v42 }
 0x6fa   :  { %v717_v45 = vmul.f32 %v1697_v43, %v713_v35 }
 0x6fb   :  { %1580 = vmatprep.subr.msk.bf16.mxu1 %vm1880_vm2, %v1578_v44 }
 0x6fc   :  { %v719_v47 = vsub.f32 2.0, %v717_v45 }
 0x6fd   :  { %v1699_v46 = vpop.eup %1698 }
 0x6fe   :  { %v716_v49 = vmul.f32 %v1699_v46, %v710_v36  ;;  %v721_v51 = vmul.f32 %v1697_v43, %v719_v47 }
 0x700   :  { %v718_v50 = vsub.f32 2.0, %v716_v49  ;;  %v723_v55 = vmul.f32 %v1693_v33, %v721_v51  ;;  %v48_v33 = vld [vmem:[#allocation5 + $0x48] sm:$0xff] }
 0x702   :  { %v720_v52 = vmul.f32 %v1699_v46, %v718_v50 }
 0x704   :  { %v722_v53 = vmul.f32 %v1695_v40, %v720_v52  ;;  %v49_v40 = vld [vmem:[#allocation5 + $0x68] sm:$0xff] }
 0x705   :  { %v1592_v38 = vpack.c.bf16 %v49_v40, %v48_v33 }
 0x706   :  { %1490 = vmatprep.mubr.msk.f32.mxu1 %vm275_vm3, %v722_v53  ;;  %v63_v53 = vld [vmem:[#allocation5 + $0xa8] ss:$0 sm:$0xff] }
 0x707   :  { %1491 = vmatmul.mubr.msk.f32.vlgmr.msra.gmra.mrb[6].mxu1 %vm275_vm3, %v723_v55 }
 0x708   :  { %1583 = vmatpush3.bf16.xpose.msk.msra.mxu1 %vm1880_vm2, %v1578_v44  ;;  %1497 = vmatprep.mubr.msk.f32.mxu1 %vm187_vm1, %v812_v56 }
 0x70f   :  { %1498 = vmatmul.mubr.msk.f32.vlgmr.msra.gmra.mrb[8].mxu1 %vm187_vm1, %v814_v58 }
 0x7da   :  { %v1492_v59 = vpop.f32.mrb[6].mxu1 }
 0x7db   :  { %v802_v60 = vpop.f32.mrb[7].mxu1 }
 0x7e2   :  { %v1499_v61 = vpop.f32.mrb[8].mxu1 }
 0x7e3   :  { %v903_v62 = vmul.f32 0.35355338, %v1499_v61  ;;  %v893_v63 = vpop.f32.mrb[9].mxu1 }
 0x7e4   :  { %v902_v2 = vmul.f32 0.35355338, %v893_v63 }
 0x7e5   :  { %v905_v3 = vadd.f32 %v903_v62, %v1896_v54 }
 0x7e6   :  { %v904_v4 = vadd.f32 %v902_v2, %v1898_v57 }
 0x7e7   :  { %v909_v5 = vsel %vm275_vm3, %v905_v3, -inf }
 0x7e8   :  { %910 = vmax.xlane.f32.xlu0 %v909_v5  ;;  %v906_v48 = vsel %vm275_vm3, %v904_v4, -inf }
 0x7e9   :  { %907 = vmax.xlane.f32.xlu1 %v906_v48 }
 0x7fa   :  { %1668 = vrot.lane.b32.xlu1 %v1872_v41, %s1804_s17 }
 0x7fe   :  { %1025 = vrot.lane.b32.xlu1 %v1931_v13, %s1790_s20 }
 0x802   :  { %1031 = vrot.lane.b32.xlu1 %v802_v60, %s1805_s18 }
 0x806   :  { %1033 = vrot.lane.b32.xlu1 %v1492_v59, %s1805_s18 }
 0x875   :  { %v911_v6 = vpop.xlane.xlu0 %910 }
 0x876   :  { %v913_v7 = vsub.f32 %v905_v3, %v911_v6  ;;  %v908_v54 = vpop.xlane.xlu1 %907 }
 0x877   :  { %v912_v8 = vsub.f32 %v904_v4, %v908_v54  ;;  %v51_v54 = vld [vmem:[#allocation5 + $0x30] sm:$0xff] }
 0x878   :  { %v916_v57 = vmul.f32 1.442695, %v913_v7  ;;  %v50_v7 = vld [vmem:[#allocation5 + $0x10] sm:$0xff] }
 0x879   :  { %v914_v9 = vmul.f32 1.442695, %v912_v8  ;;  %v1596_v8 = vpack.c.bf16 %v51_v54, %v50_v7 }
 0x87a   :  { %v1669_v10 = vpop.permute.xlu1 %1668 }
 0x87b   :  { %1700 = vpow2.f32 %v914_v9  ;;  %v1671_v15 = vunpack.i.h.bf16 %v1669_v10  ;;  %v1670_v16 = vunpack.i.l.bf16 %v1669_v10  ;;  %1597 = vmatprep.subr.bf16.mxu1 %v1596_v8  ;;  %v53_v9 = vld [vmem:[#allocation5 + $0x70] sm:$0xff] }
 0x87c   :  { %1702 = vpow2.f32 %v916_v57  ;;  %1599 = vmatpush3.bf16.msra.mxu1 %v1596_v8  ;;  %v52_v57 = vld [vmem:[#allocation5 + $0x50] sm:$0xff] }
 0x87d   :  { %v1584_v17 = vpack.c.bf16 %v1671_v15, %v1670_v16  ;;  %v1600_v10 = vpack.c.bf16 %v53_v9, %v52_v57 }
 0x87e   :  { %v1026_v37 = vpop.permute.xlu1 %1025 }
 0x87f   :  { %1585 = vmatprep.subr.bf16.mxu0 %v1584_v17  ;;  %v1046_v46 = vsel %vm187_vm1, %v1927_v11, %v1026_v37  ;;  %1601 = vmatprep.subr.bf16.mxu1 %v1600_v10 }
 0x880   :  { %1587 = vmatpush3.bf16.msra.mxu0 %v1584_v17  ;;  %1603 = vmatpush3.bf16.msra.mxu1 %v1600_v10 }
 0x882   :  { %v1032_v39 = vpop.permute.xlu1 %1031 }
 0x885   :  { %v1701_v41 = vpop.eup %1700 }
 0x886   :  { %v918_v13 = vsel %vm275_vm3, %v1701_v41, 0.0  ;;  %v1703_v18 = vpop.eup %1702  ;;  %v1034_v43 = vpop.permute.xlu1 %1033 }
 0x887   :  { %919 = vadd.xlane.f32.xlu0 %v918_v13  ;;  %v921_v19 = vsel %vm275_vm3, %v1703_v18, 0.0  ;;  %v1048_v50 = vsel %vm275_vm3, %v1046_v46, %v1034_v43 }
 0x88b   :  { %922 = vadd.xlane.f32.xlu0 %v921_v19 }
 0x8a1   :  { %1023 = vrot.lane.b32.xlu0 %v1933_v14, %s1790_s20  ;;  %v47_v14 = vld [vmem:[#allocation5 + $0x28] sm:$0xff] }
 0x8a2   :  { %v1588_v34 = vpack.c.bf16 %v47_v14, %v46_v32  ;;  %v56_v32 = vld [vmem:[#allocation5 + $0x58] sm:$0xff] }
 0x8a3   :  { %v57_v14 = vld [vmem:[#allocation5 + $0x78] sm:$0xff] }
 0x8a4   :  { %1589 = vmatprep.subr.bf16.mxu0 %v1588_v34  ;;  %v1608_v33 = vpack.c.bf16 %v57_v14, %v56_v32 }
 0x914   :  { %v920_v20 = vpop.xlane.xlu0 %919 }
 0x915   :  { %1704 = vrcp.f32 %v920_v20 }
 0x918   :  { %v923_v21 = vpop.xlane.xlu0 %922 }
 0x919   :  { %1706 = vrcp.f32 %v923_v21 }
 0x91c   :  { %v1024_v42 = vpop.permute.xlu0 %1023 }
 0x91d   :  { %v1045_v44 = vsel %vm187_vm1, %v1929_v12, %v1024_v42 }
 0x91e   :  { %v1047_v47 = vsel %vm275_vm3, %v1045_v44, %v1032_v39 }
 0x91f   :  { %v1705_v22 = vpop.eup %1704 }
 0x920   :  { %v926_v23 = vmul.f32 %v1705_v22, %v920_v20  ;;  %v60_v20 = vld [vmem:[#allocation5 + $0x90] ss:$0 sm:$0xff] }
 0x922   :  { %v928_v24 = vsub.f32 2.0, %v926_v23 }
 0x923   :  { %v1707_v25 = vpop.eup %1706 }
 0x924   :  { %v930_v26 = vmul.f32 %v1705_v22, %v928_v24  ;;  %v927_v27 = vmul.f32 %v1707_v25, %v923_v21  ;;  %v61_v22 = vld [vmem:[#allocation5 + $0x98] ss:$0 sm:$0xff] }
 0x926   :  { %v932_v28 = vmul.f32 %v1701_v41, %v930_v26  ;;  %v929_v29 = vsub.f32 2.0, %v927_v27 }
 0x928   :  { %v931_v30 = vmul.f32 %v1707_v25, %v929_v29  ;;  %1504 = vmatprep.mubr.msk.f32.mxu0 %vm275_vm3, %v932_v28  ;;  %v54_v29 = vld [vmem:[#allocation5 + $0x18] sm:$0xff] }
 0x92a   :  { %v933_v31 = vmul.f32 %v1703_v18, %v931_v30  ;;  %v55_v30 = vld [vmem:[#allocation5 + $0x38] sm:$0xff] }
 0x92c   :  { %1505 = vmatmul.mubr.msk.f32.vlgmr.msra.gmra.mrb[6].mxu0 %vm275_vm3, %v933_v31  ;;  %v1604_v31 = vpack.c.bf16 %v55_v30, %v54_v29 }
 0x92d   :  { %1591 = vmatpush3.bf16.msra.mxu0 %v1588_v34  ;;  %v64_v34 = vld [vmem:[#allocation5 + $0xb0] ss:$0 sm:$0xff] }
 0x92e   :  { %1593 = vmatprep.subr.bf16.mxu0 %v1592_v38 }
 0x931   :  { %1595 = vmatpush3.bf16.msra.mxu0 %v1592_v38 }
 0x932   :  { %1605 = vmatprep.subr.bf16.mxu0 %v1604_v31 }
 0x9ff   :  { %v1506_v35 = vpop.f32.mrb[6].mxu0 }
 0xa00   :  { %1041 = vrot.lane.b32.xlu1 %v1506_v35, %s1806_s21  ;;  %v1012_v36 = vpop.f32.mrb[7].mxu0 }
 0xa01   :  { %1039 = vrot.lane.b32.xlu0 %v1012_v36, %s1806_s21 }
 0xa72   :  { %v1042_v45 = vpop.permute.xlu1 %1041 }
 0xa73   :  { %v1040_v49 = vpop.permute.xlu0 %1039  ;;  %v1051_v52 = vsel %vm1049_vm4, %v1048_v50, %v1042_v45 }
 0xa74   :  { %v1050_v51 = vsel %vm1049_vm4, %v1047_v47, %v1040_v49 }
 0xa75   :  { %1515 = vmatprep.mubr.msk.f32.mxu0 %vm68_vm0, %v1050_v51  ;;  %v65_v51 = vld [vmem:[#allocation5 + $0xb8] ss:$0 sm:$0xff] }
 0xa76   :  { %1516 = vmatmul.mubr.msk.f32.vlgmr.msra.gmra.mrb[8].mxu0 %vm68_vm0, %v1051_v52 }
 0xa77   :  { %1607 = vmatpush3.bf16.xpose.msra.mxu0 %v1604_v31 }
 0xa78   :  { %1609 = vmatprep.subr.bf16.mxu0 %v1608_v33 }
 0xa7f   :  { %1611 = vmatpush3.bf16.xpose.msra.mxu0 %v1608_v33 }
 0xb49   :  { %v1517_v55 = vpop.f32.mrb[8].mxu0 }
 0xb4a   :  { %v1130_v56 = vadd.f32 %v1517_v55, %v63_v53  ;;  %v1124_v12 = vpop.f32.mrb[9].mxu0 }
 0xb4b   :  { %v1125_v58 = vadd.f32 %v1124_v12, %v63_v53 }
 0xb4c   :  { %v1975_v59 = vadd.f32 %v1130_v56, %v1852_v1 }
 0xb4d   :  { %v1978_v11 = vadd.f32 %v1125_v58, %v1850_v0 }
 0xb4e   :  { %v1138_v60 = vsel %vm68_vm0, %v1975_v59, 0.0 }
 0xb4f   :  { %1139 = vadd.xlane.f32.xlu1 %v1138_v60  ;;  %v1135_v61 = vsel %vm68_vm0, %v1978_v11, 0.0 }
 0xb50   :  { %1136 = vadd.xlane.f32.xlu0 %v1135_v61 }
 0xbdc   :  { %v1140_v62 = vpop.xlane.xlu1 %1139 }
 0xbdd   :  { %v1142_v63 = vmul.f32 0.03125, %v1140_v62  ;;  %v1137_v2 = vpop.xlane.xlu0 %1136 }
 0xbde   :  { %v1141_v3 = vmul.f32 0.03125, %v1137_v2 }
 0xbdf   :  { %v1144_v4 = vsub.f32 %v1975_v59, %v1142_v63 }
 0xbe0   :  { %v1143_v1 = vsub.f32 %v1978_v11, %v1141_v3 }
 0xbe1   :  { %v1146_v48 = vmul.f32 %v1144_v4, %v1144_v4 }
 0xbe2   :  { %v1145_v5 = vmul.f32 %v1143_v1, %v1143_v1 }
 0xbe3   :  { %v1150_v6 = vsel %vm68_vm0, %v1146_v48, 0.0 }
 0xbe4   :  { %v1147_v0 = vsel %vm68_vm0, %v1145_v5, 0.0 }
 0xbe5   :  { %1148 = vadd.xlane.f32.xlu0 %v1147_v0 }
 0xbe9   :  { %1151 = vadd.xlane.f32.xlu0 %v1150_v6 }
 0xc72   :  { %v1149_v15 = vpop.xlane.xlu0 %1148 }
 0xc73   :  { %v1153_v16 = vmul.f32 0.03125, %v1149_v15 }
 0xc75   :  { %v1155_v17 = vadd.f32 1e-05, %v1153_v16 }
 0xc76   :  { %v1152_v41 = vpop.xlane.xlu0 %1151 }
 0xc77   :  { %1708 = vrsqrt.f32 %v1155_v17  ;;  %v1154_v13 = vmul.f32 0.03125, %v1152_v41 }
 0xc79   :  { %v1156_v18 = vadd.f32 1e-05, %v1154_v13 }
 0xc7b   :  { %1710 = vrsqrt.f32 %v1156_v18 }
 0xc81   :  { %v1709_v19 = vpop.eup %1708 }
 0xc82   :  { %v1159_v21 = vmul.f32 %v1709_v19, %v1143_v1 }
 0xc84   :  { %v1161_v23 = vmul.f32 %v1159_v21, %v60_v20 }
 0xc85   :  { %v1711_v24 = vpop.eup %1710 }
 0xc86   :  { %v1160_v25 = vmul.f32 %v1711_v24, %v1144_v4  ;;  %v1163_v26 = vadd.f32 %v1161_v23, %v61_v22 }
 0xc88   :  { %v1162_v27 = vmul.f32 %v1160_v25, %v60_v20  ;;  %1526 = vmatprep.mubr.msk.f32.mxu1 %vm68_vm0, %v1163_v26 }
 0xc8a   :  { %v1164_v28 = vadd.f32 %v1162_v27, %v61_v22 }
 0xc8c   :  { %1527 = vmatmul.mubr.msk.f32.vlgmr.msra.gmra.mrb[10].mxu1 %vm68_vm0, %v1164_v28 }
 0xd5f   :  { %v1528_v40 = vpop.f32.mrb[10].mxu1 }
 0xd60   :  { %v1243_v38 = vadd.f32 %v1528_v40, %v64_v34  ;;  %v1237_v35 = vpop.f32.mrb[11].mxu1 }
 0xd61   :  { %v1238_v36 = vadd.f32 %v1237_v35, %v64_v34 }
 0xd62   :  { %v1250_v37 = vmul.f32 0.70710677, %v1243_v38  ;;  %v1247_v47 = vmul.f32 0.5, %v1243_v38 }
 0xd63   :  { %v1249_v39 = vmul.f32 0.70710677, %v1238_v36  ;;  %v1246_v45 = vmul.f32 0.5, %v1238_v36 }
 0xd64   :  { %1712 = verf.f32 %v1250_v37 }
 0xd65   :  { %1714 = verf.f32 %v1249_v39 }
 0xd6e   :  { %v1713_v42 = vpop.eup %1712 }
 0xd6f   :  { %v1715_v43 = vpop.eup %1714  ;;  %v1254_v44 = vadd.f32 1.0, %v1713_v42 }
 0xd70   :  { %v1253_v46 = vadd.f32 1.0, %v1715_v43 }
 0xd71   :  { %v1256_v50 = vmul.f32 %v1254_v44, %v1247_v47 }
 0xd72   :  { %v1255_v49 = vmul.f32 %v1253_v46, %v1246_v45 }
 0xd74   :  { %1537 = vmatprep.mubr.f32.mxu0 %v1255_v49 }
 0xd75   :  { %1538 = vmatmul.mubr.f32.vlgmr.msra.gmra.mrb[10].mxu0 %v1256_v50 }
 0xe48   :  { %v1539_v52 = vpop.f32.mrb[10].mxu0 }
 0xe49   :  { %v1329_v53 = vadd.f32 %v1539_v52, %v65_v51  ;;  %v1323_v55 = vpop.f32.mrb[11].mxu0 }
 0xe4a   :  { %v1324_v56 = vadd.f32 %v1323_v55, %v65_v51 }
 0xe4b   :  { %v1333_v12 = vadd.f32 %v1329_v53, %v1975_v59 }
 0xe4c   :  { %v1332_v58 = vadd.f32 %v1324_v56, %v1978_v11 }
 0xe4d   :  { %1335 = vst.msk [vmem:[#allocation7 + $0x8] sm:$0xff] %vm68_vm0, %v1333_v12 }
 0xe4e   :  { %1334 = vst.msk [vmem:[#allocation7] sm:$0xff] %vm68_vm0, %v1332_v58 }
 0xe4f   :  { %1771 = shalt.err (!%p1768_p6)
}
 0xe50   :  { %s1772_s27 = scalar_lea.hbm %s2011_s2, 256 }
 0xe51   :  { %p1773_p7 = scmp.ne.s32.totalorder %s2011_s2, %s1772_s27  ;;  %p1776_p8 = scmp.lt.u32.totalorder %s1772_s27, %s2011_s2 }
 0xe53   :  { %p1778_p9 = pnand %p1776_p8, %p1773_p7 }
 0xe55   :  { %1781 = shalt.err (!%p1778_p9)
}
 0xe56   :  { %1347 = dma.vmem_to_hbm [thread:$0]  %s1342_s23, 256, %s2011_s2, [#allocation4], %s1789_s19, %s1789_s19, %s1790_s20  }
 0xe57   :  { %1786 = dma.done.wait [#allocation4], 256  }
 0xe58   :  { %1787 = vsyncadd [#allocation4], 4294967040 }
 0xe59   :  { %1351 = vsyncpa [#allocation3], 1 }
 0xe5a   :  { %1352 = vsyncpa [#allocation6], 1 }
 0xe5b   :  { %1353 = vsyncpa [#allocation4], 1 }

</bundles_post_ra>
